<compile_context>
chip_gen: v7x
topology: tpu7x:2x2x1
jax: 0.10.0
libtpu: 0.0.40
codegen_flags: <defaults>
</compile_context>

<pallas_src>
import functools

import jax
import jax.numpy as jnp
from jax.experimental import pallas as pl
from jax.experimental.pallas import tpu as pltpu


def _round_up(x, m):
    return (x + m - 1) // m * m


def _divisor_tile(total, cap):
    """Largest multiple-of-128 divisor of `total` (itself a multiple of 128) <= cap."""
    m = total // 128
    best = 1
    for t in range(1, min(m, cap // 128) + 1):
        if m % t == 0:
            best = t
    return 128 * best


# ---------------------------------------------------------------------------
# Pallas kernel: tiled (patches @ weight), accumulate into the f32 output block,
# fused per-channel scale/shift + activation epilogue on the last K step.
# ---------------------------------------------------------------------------
def _conv_mm_kernel(p_ref, w_ref, prm_ref, o_ref, *, nl):
    # p_ref:   (TM, TK) bf16   im2col patches tile
    # w_ref:   (TK, TN) bf16   weight tile
    # prm_ref: (8, TN)  f32    row0 = scale, row1 = shift (bias/BN folded), row2 = alpha
    # o_ref:   (TM, TN) f32    resident across the K grid axis (index_map ignores k)
    k_step = pl.program_id(2)
    part = jnp.dot(p_ref[...], w_ref[...], preferred_element_type=jnp.float32)

    @pl.when(k_step == 0)
    def _init():
        o_ref[...] = part

    @pl.when(k_step > 0)
    def _accumulate():
        o_ref[...] += part

    @pl.when(k_step == pl.num_programs(2) - 1)
    def _epilogue():
        acc = o_ref[...] * prm_ref[0:1, :] + prm_ref[1:2, :]
        if nl == "relu":
            acc = jnp.maximum(acc, 0.0)
        elif nl == "prelu":
            acc = jnp.where(acc > 0.0, acc, prm_ref[2:3, :] * acc)
        o_ref[...] = acc


def _fused_matmul(patches, w2d, params, nl):
    """patches: (M, Kp) bf16 (Kp a multiple of 128, zero-padded tail columns),
    w2d: (Kp, Np) bf16, params: (8, Np) f32  ->  (M, Np) f32."""
    M, Kp = patches.shape
    Np = w2d.shape[1]

    # Tile selection: TK / TN are exact divisors of the padded dims; TM keeps at
    # least two M blocks for large M so both v7x TensorCores get work.
    TK = _divisor_tile(Kp, 2048)
    TN = _divisor_tile(Np, 512)
    if M <= 512:
        TM = _round_up(M, 16)
    else:
        TM = max(256, min(1024, _round_up((M + 1) // 2, 256)))

    grid = (pl.cdiv(M, TM), Np // TN, Kp // TK)

    # Double-buffered inputs/outputs; worst case ~16 MiB.
    vmem_bytes = 2 * (TM * TK * 2 + TK * TN * 2 + 8 * TN * 4 + TM * TN * 4)
    vmem_limit = min(48 << 20, max(16 << 20, vmem_bytes + (8 << 20)))

    # If profiling ever shows exposed DMA on the K-innermost loop, add
    # pipeline_mode=pl.Buffered(3) to the patches BlockSpec below.
    return pl.pallas_call(
        functools.partial(_conv_mm_kernel, nl=nl),
        out_shape=jax.ShapeDtypeStruct((M, Np), jnp.float32),
        grid_spec=pltpu.PrefetchScalarGridSpec(
            num_scalar_prefetch=0,
            grid=grid,
            in_specs=[
                pl.BlockSpec((TM, TK), lambda i, j, k: (i, k)),
                pl.BlockSpec((TK, TN), lambda i, j, k: (k, j)),
                pl.BlockSpec((8, TN), lambda i, j, k: (0, j)),
            ],
            out_specs=pl.BlockSpec((TM, TN), lambda i, j, k: (i, j)),
        ),
        compiler_params=pltpu.CompilerParams(
            dimension_semantics=("parallel", "parallel", "arbitrary"),
            vmem_limit_bytes=vmem_limit),
    )(patches, w2d, params)


# ---------------------------------------------------------------------------
# im2col glue (plain JAX): NHWC input, single concat, no 6-D transpose.
# ---------------------------------------------------------------------------
def _im2col_nhwc(x_nhwc, k, stride, k_pad):
    """x_nhwc: (N, H, W, C) -> (N*Ho*Wo, k*k*C + k_pad).
    Column order is window-major / channel-minor, matching
    weight.transpose(2, 3, 1, 0).reshape(k*k*Cin, Cout). The K zero-pad is
    appended inside the same concatenation (no extra pass over patches)."""
    N, H, W, C = x_nhwc.shape
    Ho = (H - k) // stride + 1
    Wo = (W - k) // stride + 1
    cols = []
    for i in range(k):
        for j in range(k):
            cols.append(
                x_nhwc[:, i:i + stride * Ho:stride, j:j + stride * Wo:stride, :])
    if k_pad > 0:
        cols.append(jnp.zeros((N, Ho, Wo, k_pad), x_nhwc.dtype))
    patches = jnp.concatenate(cols, axis=-1)          # (N, Ho, Wo, k*k*C + k_pad)
    return patches.reshape(N * Ho * Wo, k * k * C + k_pad), Ho, Wo


# ---------------------------------------------------------------------------
# Conv2d module equivalent
# ---------------------------------------------------------------------------
class Conv2dPallas:
    def __init__(self, in_channels, out_channels, kernel_size, stride=1,
                 NL="relu", same_padding=False, bn=False, key=None):
        self.in_channels = in_channels
        self.out_channels = out_channels
        self.k = kernel_size
        self.stride = stride
        self.padding = int((kernel_size - 1) / 2) if same_padding else 0
        self.nl = NL
        self.use_bn = bn

        key = jax.random.PRNGKey(0) if key is None else key
        kw, kb = jax.random.split(key, 2)
        fan_in = in_channels * kernel_size * kernel_size
        bound = 1.0 / jnp.sqrt(fan_in)
        # PyTorch default Conv2d init: uniform(-1/sqrt(fan_in), 1/sqrt(fan_in)).
        self.weight = jax.random.uniform(
            kw, (out_channels, in_channels, kernel_size, kernel_size),
            jnp.float32, -bound, bound)
        self.bias = jax.random.uniform(kb, (out_channels,), jnp.float32,
                                       -bound, bound)

        # BatchNorm2d(eps=0.001, affine=True) parameters (eval-mode running stats).
        self.bn_gamma = jnp.ones((out_channels,), jnp.float32)
        self.bn_beta = jnp.zeros((out_channels,), jnp.float32)
        self.bn_mean = jnp.zeros((out_channels,), jnp.float32)
        self.bn_var = jnp.ones((out_channels,), jnp.float32)
        self.bn_eps = 0.001

        # PyTorch nn.PReLU() uses a SINGLE shared alpha (init 0.25); we store it
        # broadcast per-channel (identical at init). Loading trained Torch
        # weights needs an explicit broadcast of the scalar into this vector.
        self.prelu_alpha = jnp.full((out_channels,), 0.25, jnp.float32)

    def __call__(self, x):
        # x: (N, Cin, H, W) float32
        N, Cin, H, W = x.shape
        Cout, ksz, s, p = self.out_channels, self.k, self.stride, self.padding

        # bf16 for the MXU (f32 accumulation in-kernel); NHWC once, before im2col.
        xb = x.astype(jnp.bfloat16).transpose(0, 2, 3, 1)
        if p > 0:
            xb = jnp.pad(xb, ((0, 0), (p, p), (p, p), (0, 0)))

        K = Cin * ksz * ksz
        Kp = _round_up(K, 128)                         # pad K only to 128, not to TK
        Np = _round_up(Cout, 128)

        patches, Ho, Wo = _im2col_nhwc(xb, ksz, s, Kp - K)   # (M, Kp) bf16

        # Weight (Cout, Cin, kH, kW) -> (kH*kW*Cin, Cout) window-major rows; tiny
        # zero-pads on the K rows / Cout cols.
        w2d = self.weight.transpose(2, 3, 1, 0).reshape(K, Cout)
        w2d = jnp.pad(w2d, ((0, Kp - K), (0, Np - Cout))).astype(jnp.bfloat16)

        # Fold conv-bias and eval-mode BN into one per-channel scale/shift:
        #   y = (conv + bias - mean) * gamma * rsqrt(var + eps) + beta
        #     = conv * scale + shift
        if self.use_bn:
            scale = self.bn_gamma * jax.lax.rsqrt(self.bn_var + self.bn_eps)
            shift = (self.bias - self.bn_mean) * scale + self.bn_beta
        else:
            scale = jnp.ones((Cout,), jnp.float32)
            shift = self.bias
        params = jnp.stack([scale, shift, self.prelu_alpha], axis=0)   # (3, Cout)
        params = jnp.pad(params, ((0, 8 - 3), (0, Np - Cout)))         # (8, Np) aligned

        out = _fused_matmul(patches, w2d, params, self.nl)             # (M, Np) f32
        out = out[:, :Cout].reshape(N, Ho, Wo, Cout)
        # TODO(synk): for layer stacks, keep NHWC / bf16 between layers and do the
        # NCHW transpose only once at the network output (kept here to match the
        # PyTorch module's output layout).
        return out.transpose(0, 3, 1, 2)


# ---------------------------------------------------------------------------
# Reference (pure JAX, f32) for correctness checking
# ---------------------------------------------------------------------------
def _reference(mod, x):
    pad = mod.padding
    y = jax.lax.conv_general_dilated(
        x, mod.weight, window_strides=(mod.stride, mod.stride),
        padding=((pad, pad), (pad, pad)),
        dimension_numbers=("NCHW", "OIHW", "NCHW"))
    y = y + mod.bias[None, :, None, None]
    if mod.use_bn:
        inv = 1.0 / jnp.sqrt(mod.bn_var + mod.bn_eps)
        y = (y - mod.bn_mean[None, :, None, None]) * inv[None, :, None, None]
        y = y * mod.bn_gamma[None, :, None, None] + mod.bn_beta[None, :, None, None]
    if mod.nl == "relu":
        y = jnp.maximum(y, 0.0)
    elif mod.nl == "prelu":
        y = jnp.where(y > 0.0, y, mod.prelu_alpha[None, :, None, None] * y)
    return y


if __name__ == "__main__":
    key = jax.random.PRNGKey(0)
    kx, kp1, kp2 = jax.random.split(key, 3)

    N, Cin, H, W = 2, 4, 16, 16
    Cout, ksize = 8, 3

    x = jax.random.normal(kx, (N, Cin, H, W), jnp.float32)

    # Case 1: relu, same padding, no BN.
    mod = Conv2dPallas(Cin, Cout, ksize, stride=1, NL="relu",
                       same_padding=True, bn=False, key=kp1)
    out = jax.block_until_ready(mod(x))
    ref = _reference(mod, x)
    assert out.shape == ref.shape == (N, Cout, H, W), (out.shape, ref.shape)
    assert jnp.allclose(out, ref, atol=2e-2, rtol=2e-2), float(
        jnp.max(jnp.abs(out - ref)))

    # Case 2: prelu + BN + stride 2 (exercises folded-BN / prelu epilogue + stride).
    mod2 = Conv2dPallas(Cin, Cout, ksize, stride=2, NL="prelu",
                        same_padding=True, bn=True, key=kp2)
    out2 = jax.block_until_ready(mod2(x))
    ref2 = _reference(mod2, x)
    assert out2.shape == ref2.shape, (out2.shape, ref2.shape)
    assert jnp.allclose(out2, ref2, atol=2e-2, rtol=2e-2), float(
        jnp.max(jnp.abs(out2 - ref2)))

    print("KERNEL_OK")
</pallas_src>

<mosaic_0001>
module attributes {stable_mosaic.version = 11 : i64} {
  func.func @_conv_mm_kernel(%arg0: i32, %arg1: i32, %arg2: i32, %arg3: memref<512x128xbf16, #tpu.memory_space<vmem>>, %arg4: memref<128x128xbf16, #tpu.memory_space<vmem>>, %arg5: memref<8x128xf32, #tpu.memory_space<vmem>>, %arg6: memref<512x128xf32, #tpu.memory_space<vmem>>) attributes {dimension_semantics = [#tpu.dimension_semantics<parallel>, #tpu.dimension_semantics<parallel>, #tpu.dimension_semantics<arbitrary>], iteration_bounds = array<i64: 1, 1, 1>, scalar_prefetch = 0 : i64, scratch_operands = 0 : i64, tpu.core_type = #tpu.core_type<tc>, window_params = [{transform_indices = @transform_0, window_bounds = array<i64: 512, 128>}, {transform_indices = @transform_1, window_bounds = array<i64: 128, 128>}, {transform_indices = @transform_2, window_bounds = array<i64: 8, 128>}, {transform_indices = @transform_3, window_bounds = array<i64: 512, 128>}]} {
    %c0 = arith.constant 0 : index
    %c0_0 = arith.constant 0 : index
    %0 = vector.load %arg3[%c0, %c0_0] : memref<512x128xbf16, #tpu.memory_space<vmem>>, vector<512x128xbf16>
    %c0_1 = arith.constant 0 : index
    %c0_2 = arith.constant 0 : index
    %1 = vector.load %arg4[%c0_1, %c0_2] : memref<128x128xbf16, #tpu.memory_space<vmem>>, vector<128x128xbf16>
    %cst = arith.constant dense<0.000000e+00> : vector<512x128xf32>
    %2 = tpu.matmul %0, %1, %cst {dimension_numbers = #tpu.dot_dimension_numbers<[1], [0], [0], [1], [0, 0, 1, 1], [], []>} : vector<512x128xbf16>, vector<128x128xbf16>, vector<512x128xf32> -> vector<512x128xf32>
    %c0_i32 = arith.constant 0 : i32
    %3 = arith.cmpi eq, %arg2, %c0_i32 : i32
    %4 = arith.extui %3 : i1 to i32
    %c0_i32_3 = arith.constant 0 : i32
    %5 = arith.cmpi ne, %4, %c0_i32_3 : i32
    scf.if %5 {
      %c0_8 = arith.constant 0 : index
      %c0_9 = arith.constant 0 : index
      %12 = vector.load %arg6[%c0_8, %c0_9] : memref<512x128xf32, #tpu.memory_space<vmem>>, vector<512x128xf32>
      tpu.vector_store %arg6[%c0_8, %c0_9], %2 {strides = array<i32>} : memref<512x128xf32, #tpu.memory_space<vmem>>, vector<512x128xf32>,
    } else {
    }
    %c0_i32_4 = arith.constant 0 : i32
    %6 = arith.cmpi sgt, %arg2, %c0_i32_4 : i32
    %7 = arith.extui %6 : i1 to i32
    %c0_i32_5 = arith.constant 0 : i32
    %8 = arith.cmpi ne, %7, %c0_i32_5 : i32
    scf.if %8 {
      %c0_8 = arith.constant 0 : index
      %c0_9 = arith.constant 0 : index
      %12 = vector.load %arg6[%c0_8, %c0_9] : memref<512x128xf32, #tpu.memory_space<vmem>>, vector<512x128xf32>
      %13 = arith.addf %12, %2 : vector<512x128xf32>
      %c0_10 = arith.constant 0 : index
      %c0_11 = arith.constant 0 : index
      %14 = vector.load %arg6[%c0_10, %c0_11] : memref<512x128xf32, #tpu.memory_space<vmem>>, vector<512x128xf32>
      tpu.vector_store %arg6[%c0_10, %c0_11], %13 {strides = array<i32>} : memref<512x128xf32, #tpu.memory_space<vmem>>, vector<512x128xf32>,
    } else {
    }
    %c0_i32_6 = arith.constant 0 : i32
    %9 = arith.cmpi eq, %arg2, %c0_i32_6 : i32
    %10 = arith.extui %9 : i1 to i32
    %c0_i32_7 = arith.constant 0 : i32
    %11 = arith.cmpi ne, %10, %c0_i32_7 : i32
    scf.if %11 {
      %c0_8 = arith.constant 0 : index
      %c0_9 = arith.constant 0 : index
      %12 = vector.load %arg6[%c0_8, %c0_9] : memref<512x128xf32, #tpu.memory_space<vmem>>, vector<512x128xf32>
      %c0_10 = arith.constant 0 : index
      %c0_11 = arith.constant 0 : index
      %13 = vector.load %arg5[%c0_10, %c0_11] : memref<8x128xf32, #tpu.memory_space<vmem>>, vector<1x128xf32>
      %14 = vector.broadcast %13 : vector<1x128xf32> to vector<512x128xf32>
      %15 = arith.mulf %12, %14 : vector<512x128xf32>
      %c1 = arith.constant 1 : index
      %c0_12 = arith.constant 0 : index
      %16 = vector.load %arg5[%c1, %c0_12] : memref<8x128xf32, #tpu.memory_space<vmem>>, vector<1x128xf32>
      %17 = vector.broadcast %16 : vector<1x128xf32> to vector<512x128xf32>
      %18 = arith.addf %15, %17 : vector<512x128xf32>
      %cst_13 = arith.constant 0.000000e+00 : f32
      %19 = vector.broadcast %cst_13 : f32 to vector<512x128xf32>
      %20 = arith.maximumf %18, %19 : vector<512x128xf32>
      %c0_14 = arith.constant 0 : index
      %c0_15 = arith.constant 0 : index
      %21 = vector.load %arg6[%c0_14, %c0_15] : memref<512x128xf32, #tpu.memory_space<vmem>>, vector<512x128xf32>
      tpu.vector_store %arg6[%c0_14, %c0_15], %20 {strides = array<i32>} : memref<512x128xf32, #tpu.memory_space<vmem>>, vector<512x128xf32>,
    } else {
    }
    return
  }
  func.func @transform_0(%arg0: i32, %arg1: i32, %arg2: i32) -> (i32, i32) {
    %c0_i32 = arith.constant 0 : i32
    return %arg0, %arg2 : i32, i32
  }
  func.func @transform_1(%arg0: i32, %arg1: i32, %arg2: i32) -> (i32, i32) {
    %c0_i32 = arith.constant 0 : i32
    return %arg2, %arg1 : i32, i32
  }
  func.func @transform_2(%arg0: i32, %arg1: i32, %arg2: i32) -> (i32, i32) {
    %c0_i32 = arith.constant 0 : i32
    %c0_i32_0 = arith.constant 0 : i32
    return %c0_i32, %arg1 : i32, i32
  }
  func.func @transform_3(%arg0: i32, %arg1: i32, %arg2: i32) -> (i32, i32) {
    %c0_i32 = arith.constant 0 : i32
    return %arg0, %arg1 : i32, i32
  }
}

</mosaic_0001>

<bundles_post_ra>
// kernel: tpu_custom_call.1
= control target key start
LH: loop header
LB: loop body
LE: loop exit
PB: predicated region body
PF: predicated region fallthrough
CT: control target
= control target key end

     0   :  { %8 = vsyncpa [#allocation3], 0  ;;  %s1814_s0 = inlined_call_operand.hbm [shape: bf16[512,128], index: 0, kind: input, shape index: {}]   ;;  %s1815_s1 = inlined_call_operand.hbm [shape: bf16[128,128], index: 1, kind: input, shape index: {}]   ;;  %s1816_s2 = inlined_call_operand.hbm [shape: f32[8,128], index: 2, kind: input, shape index: {}]   ;;  %s1817_s3 = inlined_call_operand.hbm [shape: f32[512,128], index: 3, kind: output, shape index: {}]  }
   0x1   :  { %9 = vsyncpa [#allocation6], 0 }
   0x2   :  { %10 = vsyncpa [#allocation4], 0  ;;  %s1599_s12 = smov [#allocation5]   ;;  %s1600_s14 = smov [#allocation2]  }
   0x3   :  { %s28_s13 = sshll.u32 %s1599_s12, 4  ;;  %s16_s15 = sshll.u32 %s1600_s14, 4  ;;  %s29_s13 = int_to_ptr.vmem [resolvable:$true] %s28_s13  ;;  %s1627_s15 = int_to_ptr.vmem [resolvable:$true] %s16_s15 }
   0x4   :  { %s1505_s18 = scalar_lea.hbm %s1815_s1, 1024 }
   0x5   :  { %p1506_p0 = scmp.ne.s32.totalorder %s1815_s1, %s1505_s18  ;;  %p1509_p1 = scmp.lt.u32.totalorder %s1505_s18, %s1815_s1 }
   0x7   :  { %p1511_p2 = pnand %p1509_p1, %p1506_p0 }
   0x9   :  { %1514 = shalt.err (!%p1511_p2)
}
   0xa   :  { %s1515_s23 = scalar_lea.vmem %s29_s13, 1024  ;;  %p1520_p4 = scmp.lt.s32.totalorder %s29_s13, %s29_s13 }
   0xb   :  { %p1516_p3 = scmp.ne.s32.totalorder %s29_s13, %s1515_s23  ;;  %p1521_p5 = scmp.lt.s32.totalorder %s1515_s23, %s1515_s23 }
   0xd   :  { %p1522_p6 = por %p1521_p5, %p1520_p4 }
   0xf   :  { %p1523_p7 = pnand %p1522_p6, %p1516_p3 }
  0x11   :  { %1526 = shalt.err (!%p1523_p7)
}
  0x12   :  { %s1601_s24 = smov 64   ;;  %s1602_s25 = smov 4  }
  0x13   :  { %34 = dma.hbm_to_vmem [thread:$0]  %s1815_s1, 1024, %s29_s13, [#allocation6], %s1601_s24, %s1601_s24, %s1602_s25  }
  0x14   :  { %s1527_s30 = scalar_lea.hbm %s1814_s0, 4096 }
  0x15   :  { %p1528_p8 = scmp.ne.s32.totalorder %s1814_s0, %s1527_s30  ;;  %p1531_p9 = scmp.lt.u32.totalorder %s1527_s30, %s1814_s0 }
  0x17   :  { %p1533_p10 = pnand %p1531_p9, %p1528_p8 }
  0x19   :  { %1536 = shalt.err (!%p1533_p10)
}
  0x1a   :  { %s1537_s8 = scalar_lea.vmem %s1627_s15, 4096  ;;  %p1542_p12 = scmp.lt.s32.totalorder %s1627_s15, %s1627_s15 }
  0x1b   :  { %p1538_p11 = scmp.ne.s32.totalorder %s1627_s15, %s1537_s8  ;;  %p1543_p13 = scmp.lt.s32.totalorder %s1537_s8, %s1537_s8 }
  0x1d   :  { %p1544_p0 = por %p1543_p13, %p1542_p12 }
  0x1f   :  { %p1545_p1 = pnand %p1544_p0, %p1538_p11 }
  0x21   :  { %1548 = shalt.err (!%p1545_p1)
}
  0x22   :  { %22 = dma.hbm_to_vmem [thread:$0]  %s1814_s0, 4096, %s1627_s15, [#allocation3], %s1601_s24, %s1601_s24, %s1602_s25  }
  0x23   :  { %s1603_s10 = smov [#allocation7]   ;;  %s1549_s14 = scalar_lea.hbm %s1816_s2, 128 }
  0x24   :  { %s41_s11 = sshll.u32 %s1603_s10, 4  ;;  %p1550_p2 = scmp.ne.s32.totalorder %s1816_s2, %s1549_s14  ;;  %s42_s11 = int_to_ptr.vmem [resolvable:$true] %s41_s11 }
  0x25   :  { %p1553_p3 = scmp.lt.u32.totalorder %s1549_s14, %s1816_s2 }
  0x27   :  { %p1555_p4 = pnand %p1553_p3, %p1550_p2 }
  0x29   :  { %1558 = shalt.err (!%p1555_p4)
}
  0x2a   :  { %s1559_s20 = scalar_lea.vmem %s42_s11, 128  ;;  %p1564_p6 = scmp.lt.s32.totalorder %s42_s11, %s42_s11 }
  0x2b   :  { %p1560_p5 = scmp.ne.s32.totalorder %s42_s11, %s1559_s20  ;;  %p1565_p7 = scmp.lt.s32.totalorder %s1559_s20, %s1559_s20 }
  0x2d   :  { %p1566_p8 = por %p1565_p7, %p1564_p6 }
  0x2f   :  { %p1567_p9 = pnand %p1566_p8, %p1560_p5 }
  0x31   :  { %1570 = shalt.err (!%p1567_p9)
}
  0x32   :  { %44 = dma.hbm_to_vmem [thread:$0]  %s1816_s2, 128, %s42_s11, [#allocation6]  }
  0x33   :  { %1593 = dma.done.wait [#allocation3], 4096  }
  0x34   :  { %1594 = vsyncadd [#allocation3], 4294963200 }
  0x35   :  { %1595 = dma.done.wait [#allocation6], 1152  }
  0x36   :  { %1596 = vsyncadd [#allocation6], 4294966144  ;;  %v1465_v0 = vld [vmem:[#allocation5] sm:$0xff]   ;;  %v1466_v1 = vld [vmem:[#allocation5 + $0x8] sm:$0xff]   ;;  %s1604_s2 = smov [#allocation8]  }
  0x37   :  { %1361 = vmatprep.subr.bf16.mxu0 %v1465_v0  ;;  %1441 = vmatprep.subr.bf16.mxu1 %v1465_v0  ;;  %v1467_v2 = vld [vmem:[#allocation5 + $0x10] sm:$0xff]   ;;  %v1468_v3 = vld [vmem:[#allocation5 + $0x18] sm:$0xff]   ;;  %v1473_v4 = vld [vmem:[#allocation2] sm:$0xff]   ;;  %s1266_s21 = sshll.u32 %s1604_s2, 4  ;;  %s1267_s21 = int_to_ptr.vmem [resolvable:$true] %s1266_s21 }
  0x38   :  { %1362 = vmatpush3.bf16.msra.mxu0 %v1465_v0  ;;  %1449 = vmatpush3.bf16.msra.mxu1 %v1465_v0  ;;  %v1474_v5 = vld [vmem:[#allocation2 + $0x80] sm:$0xff]   ;;  %v1470_v7 = vld [vmem:[#allocation5 + $0x28] sm:$0xff]   ;;  %v1471_v8 = vld [vmem:[#allocation5 + $0x30] sm:$0xff]   ;;  %s1571_s22 = scalar_lea.vmem %s1267_s21, 8192  ;;  %p1576_p11 = scmp.lt.s32.totalorder %s1267_s21, %s1267_s21 }
  0x39   :  { %1363 = vmatprep.subr.bf16.mxu0 %v1466_v1  ;;  %1442 = vmatprep.subr.bf16.mxu1 %v1466_v1  ;;  %v1469_v6 = vld [vmem:[#allocation5 + $0x20] sm:$0xff]   ;;  %v1472_v9 = vld [vmem:[#allocation5 + $0x38] sm:$0xff]   ;;  %v1475_v10 = vld [vmem:[#allocation2 + $0x8] sm:$0xff]   ;;  %p1572_p10 = scmp.ne.s32.totalorder %s1267_s21, %s1571_s22  ;;  %p1577_p12 = scmp.lt.s32.totalorder %s1571_s22, %s1571_s22 }
  0x3a   :  { %1377 = vmatprep.mubr.bf16.mxu0 %v1473_v4  ;;  %1409 = vmatprep.mubr.bf16.mxu1 %v1474_v5  ;;  %v1476_v11 = vld [vmem:[#allocation2 + $0x88] sm:$0xff]   ;;  %v1477_v12 = vld [vmem:[#allocation2 + $0x10] sm:$0xff]   ;;  %v1479_v14 = vld [vmem:[#allocation2 + $0x18] sm:$0xff]  }
  0x3b   :  { %v1478_v13 = vld [vmem:[#allocation2 + $0x90] sm:$0xff]   ;;  %v1480_v15 = vld [vmem:[#allocation2 + $0x98] sm:$0xff]   ;;  %v1481_v16 = vld [vmem:[#allocation2 + $0x20] sm:$0xff]   ;;  %p1578_p13 = por %p1577_p12, %p1576_p11 }
  0x3c   :  { %1364 = vmatpush3.bf16.msra.mxu0 %v1466_v1  ;;  %1450 = vmatpush3.bf16.msra.mxu1 %v1466_v1  ;;  %v1482_v17 = vld [vmem:[#allocation2 + $0xa0] sm:$0xff]   ;;  %v1483_v18 = vld [vmem:[#allocation2 + $0x28] sm:$0xff]   ;;  %v1485_v20 = vld [vmem:[#allocation2 + $0x30] sm:$0xff]  }
  0x3d   :  { %1365 = vmatprep.subr.bf16.mxu0 %v1467_v2  ;;  %1443 = vmatprep.subr.bf16.mxu1 %v1467_v2  ;;  %v1484_v19 = vld [vmem:[#allocation2 + $0xa8] sm:$0xff]   ;;  %v1486_v21 = vld [vmem:[#allocation2 + $0xb0] sm:$0xff]   ;;  %v1487_v22 = vld [vmem:[#allocation2 + $0x38] sm:$0xff]   ;;  %p1579_p0 = pnand %p1578_p13, %p1572_p10 }
  0x3e   :  { %v1488_v23 = vld [vmem:[#allocation2 + $0xb8] sm:$0xff]   ;;  %v1489_v24 = vld [vmem:[#allocation2 + $0x40] sm:$0xff]   ;;  %v1491_v26 = vld [vmem:[#allocation2 + $0x48] sm:$0xff]  }
  0x3f   :  { %v1490_v25 = vld [vmem:[#allocation2 + $0xc0] sm:$0xff]   ;;  %v1492_v27 = vld [vmem:[#allocation2 + $0xc8] sm:$0xff]   ;;  %v1493_v28 = vld [vmem:[#allocation2 + $0x50] sm:$0xff]  }
  0x40   :  { %1366 = vmatpush3.bf16.msra.mxu0 %v1467_v2  ;;  %1451 = vmatpush3.bf16.msra.mxu1 %v1467_v2  ;;  %v1494_v29 = vld [vmem:[#allocation2 + $0xd0] sm:$0xff]   ;;  %v1495_v30 = vld [vmem:[#allocation2 + $0x58] sm:$0xff]   ;;  %v1497_v32 = vld [vmem:[#allocation2 + $0x60] sm:$0xff]  }
  0x41   :  { %1367 = vmatprep.subr.bf16.mxu0 %v1468_v3  ;;  %1444 = vmatprep.subr.bf16.mxu1 %v1468_v3  ;;  %v1496_v31 = vld [vmem:[#allocation2 + $0xd8] sm:$0xff]   ;;  %v1498_v33 = vld [vmem:[#allocation2 + $0xe0] sm:$0xff]   ;;  %v1499_v34 = vld [vmem:[#allocation2 + $0x68] sm:$0xff]  }
  0x42   :  { %v1500_v35 = vld [vmem:[#allocation2 + $0xe8] sm:$0xff]   ;;  %v1501_v36 = vld [vmem:[#allocation2 + $0x70] sm:$0xff]   ;;  %v1503_v38 = vld [vmem:[#allocation2 + $0x78] sm:$0xff]  }
  0x43   :  { %v1502_v37 = vld [vmem:[#allocation2 + $0xf0] sm:$0xff]   ;;  %v1504_v39 = vld [vmem:[#allocation2 + $0xf8] sm:$0xff]   ;;  %v1670_v40 = vld [vmem:[#allocation7] ss:$0 sm:$0xff] }
  0x44   :  { %1368 = vmatpush3.bf16.msra.mxu0 %v1468_v3  ;;  %1452 = vmatpush3.bf16.msra.mxu1 %v1468_v3  ;;  %v1672_v42 = vld [vmem:[#allocation7 + $0x1] ss:$0 sm:$0xff] }
  0x45   :  { %1369 = vmatprep.subr.bf16.mxu0 %v1469_v6  ;;  %1445 = vmatprep.subr.bf16.mxu1 %v1469_v6 }
  0x48   :  { %1370 = vmatpush3.bf16.msra.mxu0 %v1469_v6  ;;  %1453 = vmatpush3.bf16.msra.mxu1 %v1469_v6 }
  0x49   :  { %1371 = vmatprep.subr.bf16.mxu0 %v1470_v7  ;;  %1446 = vmatprep.subr.bf16.mxu1 %v1470_v7 }
  0x4c   :  { %1372 = vmatpush3.bf16.msra.mxu0 %v1470_v7  ;;  %1454 = vmatpush3.bf16.msra.mxu1 %v1470_v7 }
  0x4d   :  { %1373 = vmatprep.subr.bf16.mxu0 %v1471_v8  ;;  %1447 = vmatprep.subr.bf16.mxu1 %v1471_v8 }
  0x50   :  { %1374 = vmatpush3.bf16.msra.mxu0 %v1471_v8  ;;  %1455 = vmatpush3.bf16.msra.mxu1 %v1471_v8 }
  0x51   :  { %1375 = vmatprep.subr.bf16.mxu0 %v1472_v9  ;;  %1448 = vmatprep.subr.bf16.mxu1 %v1472_v9 }
  0x54   :  { %1376 = vmatpush3.bf16.msra.mxu0 %v1472_v9  ;;  %1456 = vmatpush3.bf16.msra.mxu1 %v1472_v9 }
  0x57   :  { %1378 = vmatmul.mubr.bf16.vlgmr.msra.gmra.mrb[0].mxu0 %v1475_v10  ;;  %1410 = vmatmul.mubr.bf16.vlgmr.msra.gmra.mrb[0].mxu1 %v1476_v11 }
  0x58   :  { %1381 = vmatprep.mubr.bf16.mxu0 %v1477_v12  ;;  %1413 = vmatprep.mubr.bf16.mxu1 %v1478_v13 }
  0x5f   :  { %1382 = vmatmul.mubr.bf16.gmra.mrb[4].mxu0 %v1479_v14  ;;  %1414 = vmatmul.mubr.bf16.gmra.mrb[4].mxu1 %v1480_v15 }
  0x60   :  { %1385 = vmatprep.mubr.bf16.mxu0 %v1481_v16  ;;  %1417 = vmatprep.mubr.bf16.mxu1 %v1482_v17 }
  0x67   :  { %1386 = vmatmul.mubr.bf16.gmra.mrb[8].mxu0 %v1483_v18  ;;  %1418 = vmatmul.mubr.bf16.gmra.mrb[8].mxu1 %v1484_v19 }
  0x68   :  { %1389 = vmatprep.mubr.bf16.mxu0 %v1485_v20  ;;  %1421 = vmatprep.mubr.bf16.mxu1 %v1486_v21 }
  0x6f   :  { %1390 = vmatmul.mubr.bf16.gmra.mrb[12].mxu0 %v1487_v22  ;;  %1422 = vmatmul.mubr.bf16.gmra.mrb[12].mxu1 %v1488_v23 }
  0x70   :  { %1393 = vmatprep.mubr.bf16.mxu0 %v1489_v24  ;;  %1425 = vmatprep.mubr.bf16.mxu1 %v1490_v25 }
  0x77   :  { %1394 = vmatmul.mubr.bf16.gmra.mrb[16].mxu0 %v1491_v26  ;;  %1426 = vmatmul.mubr.bf16.gmra.mrb[16].mxu1 %v1492_v27 }
  0x78   :  { %1397 = vmatprep.mubr.bf16.mxu0 %v1493_v28  ;;  %1429 = vmatprep.mubr.bf16.mxu1 %v1494_v29 }
  0x7f   :  { %1398 = vmatmul.mubr.bf16.gmra.mrb[20].mxu0 %v1495_v30  ;;  %1430 = vmatmul.mubr.bf16.gmra.mrb[20].mxu1 %v1496_v31 }
  0x80   :  { %1401 = vmatprep.mubr.bf16.mxu0 %v1497_v32  ;;  %1433 = vmatprep.mubr.bf16.mxu1 %v1498_v33 }
  0x87   :  { %1402 = vmatmul.mubr.bf16.gmra.mrb[24].mxu0 %v1499_v34  ;;  %1434 = vmatmul.mubr.bf16.gmra.mrb[24].mxu1 %v1500_v35 }
  0x88   :  { %1405 = vmatprep.mubr.bf16.mxu0 %v1501_v36  ;;  %1437 = vmatprep.mubr.bf16.mxu1 %v1502_v37 }
  0x8f   :  { %1406 = vmatmul.mubr.bf16.gmra.mrb[28].mxu0 %v1503_v38  ;;  %1438 = vmatmul.mubr.bf16.gmra.mrb[28].mxu1 %v1504_v39 }
 0x12a   :  { %v1379_v41 = vpop.f32.mrb[0].mxu0  ;;  %v1411_v43 = vpop.f32.mrb[0].mxu1 }
 0x12b   :  { %v1002_v44 = vmul.f32 %v1379_v41, %v1670_v40  ;;  %v1034_v45 = vmul.f32 %v1411_v43, %v1670_v40  ;;  %v409_v46 = vpop.f32.mrb[1].mxu0  ;;  %v537_v47 = vpop.f32.mrb[1].mxu1 }
 0x12c   :  { %v1000_v48 = vmul.f32 %v1670_v40, %v409_v46  ;;  %v1032_v49 = vmul.f32 %v1670_v40, %v537_v47  ;;  %v1380_v50 = vpop.f32.mrb[2].mxu0  ;;  %v1412_v51 = vpop.f32.mrb[2].mxu1 }
 0x12d   :  { %v1071_v52 = vadd.f32 %v1672_v42, %v1002_v44  ;;  %v1103_v53 = vadd.f32 %v1672_v42, %v1034_v45  ;;  %v1003_v54 = vmul.f32 %v1380_v50, %v1670_v40  ;;  %v1035_v55 = vmul.f32 %v1412_v51, %v1670_v40  ;;  %v412_v56 = vpop.f32.mrb[3].mxu0  ;;  %v540_v57 = vpop.f32.mrb[3].mxu1 }
 0x12e   :  { %v1069_v58 = vadd.f32 %v1672_v42, %v1000_v48  ;;  %v1101_v59 = vadd.f32 %v1672_v42, %v1032_v49  ;;  %v1001_v60 = vmul.f32 %v1670_v40, %v412_v56  ;;  %v1033_v61 = vmul.f32 %v1670_v40, %v540_v57 }
 0x12f   :  { %v1135_v62 = vmax.f32 %v1071_v52, 0.0  ;;  %v1167_v63 = vmax.f32 %v1103_v53, 0.0  ;;  %v1072_v0 = vadd.f32 %v1672_v42, %v1003_v54  ;;  %v1104_v1 = vadd.f32 %v1672_v42, %v1035_v55 }
 0x130   :  { %v1133_v2 = vmax.f32 %v1069_v58, 0.0  ;;  %v1165_v3 = vmax.f32 %v1101_v59, 0.0  ;;  %v1070_v4 = vadd.f32 %v1672_v42, %v1001_v60  ;;  %v1102_v5 = vadd.f32 %v1672_v42, %v1033_v61 }
 0x131   :  { %1199 = vst [vmem:[#allocation8 + $0x10] sm:$0xff] %v1135_v62  ;;  %1231 = vst [vmem:[#allocation8 + $0x110] sm:$0xff] %v1167_v63  ;;  %v1136_v6 = vmax.f32 %v1072_v0, 0.0  ;;  %v1168_v7 = vmax.f32 %v1104_v1, 0.0 }
 0x132   :  { %1197 = vst [vmem:[#allocation8] sm:$0xff] %v1133_v2  ;;  %1229 = vst [vmem:[#allocation8 + $0x100] sm:$0xff] %v1165_v3  ;;  %v1134_v8 = vmax.f32 %v1070_v4, 0.0  ;;  %v1166_v9 = vmax.f32 %v1102_v5, 0.0  ;;  %v1383_v10 = vpop.f32.mrb[4].mxu0  ;;  %v1415_v11 = vpop.f32.mrb[4].mxu1 }
 0x133   :  { %1200 = vst [vmem:[#allocation8 + $0x18] sm:$0xff] %v1136_v6  ;;  %1232 = vst [vmem:[#allocation8 + $0x118] sm:$0xff] %v1168_v7  ;;  %v1006_v12 = vmul.f32 %v1383_v10, %v1670_v40  ;;  %v1038_v13 = vmul.f32 %v1415_v11, %v1670_v40  ;;  %v425_v14 = vpop.f32.mrb[5].mxu0  ;;  %v553_v15 = vpop.f32.mrb[5].mxu1 }
 0x134   :  { %1198 = vst [vmem:[#allocation8 + $0x8] sm:$0xff] %v1134_v8  ;;  %1230 = vst [vmem:[#allocation8 + $0x108] sm:$0xff] %v1166_v9  ;;  %v1004_v16 = vmul.f32 %v1670_v40, %v425_v14  ;;  %v1036_v17 = vmul.f32 %v1670_v40, %v553_v15  ;;  %v1384_v18 = vpop.f32.mrb[6].mxu0  ;;  %v1416_v19 = vpop.f32.mrb[6].mxu1 }
 0x135   :  { %v1075_v20 = vadd.f32 %v1672_v42, %v1006_v12  ;;  %v1107_v21 = vadd.f32 %v1672_v42, %v1038_v13  ;;  %v1007_v22 = vmul.f32 %v1384_v18, %v1670_v40  ;;  %v1039_v23 = vmul.f32 %v1416_v19, %v1670_v40  ;;  %v428_v24 = vpop.f32.mrb[7].mxu0  ;;  %v556_v25 = vpop.f32.mrb[7].mxu1 }
 0x136   :  { %v1073_v26 = vadd.f32 %v1672_v42, %v1004_v16  ;;  %v1105_v27 = vadd.f32 %v1672_v42, %v1036_v17  ;;  %v1005_v28 = vmul.f32 %v1670_v40, %v428_v24  ;;  %v1037_v29 = vmul.f32 %v1670_v40, %v556_v25 }
 0x137   :  { %v1139_v30 = vmax.f32 %v1075_v20, 0.0  ;;  %v1171_v31 = vmax.f32 %v1107_v21, 0.0  ;;  %v1076_v32 = vadd.f32 %v1672_v42, %v1007_v22  ;;  %v1108_v33 = vadd.f32 %v1672_v42, %v1039_v23 }
 0x138   :  { %v1137_v34 = vmax.f32 %v1073_v26, 0.0  ;;  %v1169_v35 = vmax.f32 %v1105_v27, 0.0  ;;  %v1074_v36 = vadd.f32 %v1672_v42, %v1005_v28  ;;  %v1106_v37 = vadd.f32 %v1672_v42, %v1037_v29 }
 0x139   :  { %1203 = vst [vmem:[#allocation8 + $0x30] sm:$0xff] %v1139_v30  ;;  %1235 = vst [vmem:[#allocation8 + $0x130] sm:$0xff] %v1171_v31  ;;  %v1140_v38 = vmax.f32 %v1076_v32, 0.0  ;;  %v1172_v39 = vmax.f32 %v1108_v33, 0.0 }
 0x13a   :  { %1201 = vst [vmem:[#allocation8 + $0x20] sm:$0xff] %v1137_v34  ;;  %1233 = vst [vmem:[#allocation8 + $0x120] sm:$0xff] %v1169_v35  ;;  %v1138_v41 = vmax.f32 %v1074_v36, 0.0  ;;  %v1170_v43 = vmax.f32 %v1106_v37, 0.0  ;;  %v1387_v44 = vpop.f32.mrb[8].mxu0  ;;  %v1419_v45 = vpop.f32.mrb[8].mxu1 }
 0x13b   :  { %1204 = vst [vmem:[#allocation8 + $0x38] sm:$0xff] %v1140_v38  ;;  %1236 = vst [vmem:[#allocation8 + $0x138] sm:$0xff] %v1172_v39  ;;  %v1010_v46 = vmul.f32 %v1387_v44, %v1670_v40  ;;  %v1042_v47 = vmul.f32 %v1419_v45, %v1670_v40  ;;  %v441_v48 = vpop.f32.mrb[9].mxu0  ;;  %v569_v49 = vpop.f32.mrb[9].mxu1 }
 0x13c   :  { %1202 = vst [vmem:[#allocation8 + $0x28] sm:$0xff] %v1138_v41  ;;  %1234 = vst [vmem:[#allocation8 + $0x128] sm:$0xff] %v1170_v43  ;;  %v1008_v50 = vmul.f32 %v1670_v40, %v441_v48  ;;  %v1040_v51 = vmul.f32 %v1670_v40, %v569_v49  ;;  %v1388_v52 = vpop.f32.mrb[10].mxu0  ;;  %v1420_v53 = vpop.f32.mrb[10].mxu1 }
 0x13d   :  { %v1079_v54 = vadd.f32 %v1672_v42, %v1010_v46  ;;  %v1111_v55 = vadd.f32 %v1672_v42, %v1042_v47  ;;  %v1011_v56 = vmul.f32 %v1388_v52, %v1670_v40  ;;  %v1043_v57 = vmul.f32 %v1420_v53, %v1670_v40  ;;  %v444_v58 = vpop.f32.mrb[11].mxu0  ;;  %v572_v59 = vpop.f32.mrb[11].mxu1 }
 0x13e   :  { %v1077_v60 = vadd.f32 %v1672_v42, %v1008_v50  ;;  %v1109_v61 = vadd.f32 %v1672_v42, %v1040_v51  ;;  %v1009_v62 = vmul.f32 %v1670_v40, %v444_v58  ;;  %v1041_v63 = vmul.f32 %v1670_v40, %v572_v59 }
 0x13f   :  { %v1143_v0 = vmax.f32 %v1079_v54, 0.0  ;;  %v1175_v1 = vmax.f32 %v1111_v55, 0.0  ;;  %v1080_v2 = vadd.f32 %v1672_v42, %v1011_v56  ;;  %v1112_v3 = vadd.f32 %v1672_v42, %v1043_v57 }
 0x140   :  { %v1141_v4 = vmax.f32 %v1077_v60, 0.0  ;;  %v1173_v5 = vmax.f32 %v1109_v61, 0.0  ;;  %v1078_v6 = vadd.f32 %v1672_v42, %v1009_v62  ;;  %v1110_v7 = vadd.f32 %v1672_v42, %v1041_v63 }
 0x141   :  { %1207 = vst [vmem:[#allocation8 + $0x50] sm:$0xff] %v1143_v0  ;;  %1239 = vst [vmem:[#allocation8 + $0x150] sm:$0xff] %v1175_v1  ;;  %v1144_v8 = vmax.f32 %v1080_v2, 0.0  ;;  %v1176_v9 = vmax.f32 %v1112_v3, 0.0 }
 0x142   :  { %1205 = vst [vmem:[#allocation8 + $0x40] sm:$0xff] %v1141_v4  ;;  %1237 = vst [vmem:[#allocation8 + $0x140] sm:$0xff] %v1173_v5  ;;  %v1142_v10 = vmax.f32 %v1078_v6, 0.0  ;;  %v1174_v11 = vmax.f32 %v1110_v7, 0.0  ;;  %v1391_v12 = vpop.f32.mrb[12].mxu0  ;;  %v1423_v13 = vpop.f32.mrb[12].mxu1 }
 0x143   :  { %1208 = vst [vmem:[#allocation8 + $0x58] sm:$0xff] %v1144_v8  ;;  %1240 = vst [vmem:[#allocation8 + $0x158] sm:$0xff] %v1176_v9  ;;  %v1014_v14 = vmul.f32 %v1391_v12, %v1670_v40  ;;  %v1046_v15 = vmul.f32 %v1423_v13, %v1670_v40  ;;  %v457_v16 = vpop.f32.mrb[13].mxu0  ;;  %v585_v17 = vpop.f32.mrb[13].mxu1 }
 0x144   :  { %1206 = vst [vmem:[#allocation8 + $0x48] sm:$0xff] %v1142_v10  ;;  %1238 = vst [vmem:[#allocation8 + $0x148] sm:$0xff] %v1174_v11  ;;  %v1012_v18 = vmul.f32 %v1670_v40, %v457_v16  ;;  %v1044_v19 = vmul.f32 %v1670_v40, %v585_v17  ;;  %v1392_v20 = vpop.f32.mrb[14].mxu0  ;;  %v1424_v21 = vpop.f32.mrb[14].mxu1 }
 0x145   :  { %v1083_v22 = vadd.f32 %v1672_v42, %v1014_v14  ;;  %v1115_v23 = vadd.f32 %v1672_v42, %v1046_v15  ;;  %v1015_v24 = vmul.f32 %v1392_v20, %v1670_v40  ;;  %v1047_v25 = vmul.f32 %v1424_v21, %v1670_v40  ;;  %v460_v26 = vpop.f32.mrb[15].mxu0  ;;  %v588_v27 = vpop.f32.mrb[15].mxu1 }
 0x146   :  { %v1081_v28 = vadd.f32 %v1672_v42, %v1012_v18  ;;  %v1113_v29 = vadd.f32 %v1672_v42, %v1044_v19  ;;  %v1013_v30 = vmul.f32 %v1670_v40, %v460_v26  ;;  %v1045_v31 = vmul.f32 %v1670_v40, %v588_v27 }
 0x147   :  { %v1147_v32 = vmax.f32 %v1083_v22, 0.0  ;;  %v1179_v33 = vmax.f32 %v1115_v23, 0.0  ;;  %v1084_v34 = vadd.f32 %v1672_v42, %v1015_v24  ;;  %v1116_v35 = vadd.f32 %v1672_v42, %v1047_v25 }
 0x148   :  { %v1145_v36 = vmax.f32 %v1081_v28, 0.0  ;;  %v1177_v37 = vmax.f32 %v1113_v29, 0.0  ;;  %v1082_v38 = vadd.f32 %v1672_v42, %v1013_v30  ;;  %v1114_v39 = vadd.f32 %v1672_v42, %v1045_v31 }
 0x149   :  { %1211 = vst [vmem:[#allocation8 + $0x70] sm:$0xff] %v1147_v32  ;;  %1243 = vst [vmem:[#allocation8 + $0x170] sm:$0xff] %v1179_v33  ;;  %v1148_v41 = vmax.f32 %v1084_v34, 0.0  ;;  %v1180_v43 = vmax.f32 %v1116_v35, 0.0 }
 0x14a   :  { %1209 = vst [vmem:[#allocation8 + $0x60] sm:$0xff] %v1145_v36  ;;  %1241 = vst [vmem:[#allocation8 + $0x160] sm:$0xff] %v1177_v37  ;;  %v1146_v44 = vmax.f32 %v1082_v38, 0.0  ;;  %v1178_v45 = vmax.f32 %v1114_v39, 0.0  ;;  %v1395_v46 = vpop.f32.mrb[16].mxu0  ;;  %v1427_v47 = vpop.f32.mrb[16].mxu1 }
 0x14b   :  { %1212 = vst [vmem:[#allocation8 + $0x78] sm:$0xff] %v1148_v41  ;;  %1244 = vst [vmem:[#allocation8 + $0x178] sm:$0xff] %v1180_v43  ;;  %v1018_v48 = vmul.f32 %v1395_v46, %v1670_v40  ;;  %v1050_v49 = vmul.f32 %v1427_v47, %v1670_v40  ;;  %v473_v50 = vpop.f32.mrb[17].mxu0  ;;  %v601_v51 = vpop.f32.mrb[17].mxu1 }
 0x14c   :  { %1210 = vst [vmem:[#allocation8 + $0x68] sm:$0xff] %v1146_v44  ;;  %1242 = vst [vmem:[#allocation8 + $0x168] sm:$0xff] %v1178_v45  ;;  %v1016_v52 = vmul.f32 %v1670_v40, %v473_v50  ;;  %v1048_v53 = vmul.f32 %v1670_v40, %v601_v51  ;;  %v1396_v54 = vpop.f32.mrb[18].mxu0  ;;  %v1428_v55 = vpop.f32.mrb[18].mxu1 }
 0x14d   :  { %v1087_v56 = vadd.f32 %v1672_v42, %v1018_v48  ;;  %v1119_v57 = vadd.f32 %v1672_v42, %v1050_v49  ;;  %v1019_v58 = vmul.f32 %v1396_v54, %v1670_v40  ;;  %v1051_v59 = vmul.f32 %v1428_v55, %v1670_v40  ;;  %v476_v60 = vpop.f32.mrb[19].mxu0  ;;  %v604_v61 = vpop.f32.mrb[19].mxu1 }
 0x14e   :  { %v1085_v62 = vadd.f32 %v1672_v42, %v1016_v52  ;;  %v1117_v63 = vadd.f32 %v1672_v42, %v1048_v53  ;;  %v1017_v0 = vmul.f32 %v1670_v40, %v476_v60  ;;  %v1049_v1 = vmul.f32 %v1670_v40, %v604_v61 }
 0x14f   :  { %v1151_v2 = vmax.f32 %v1087_v56, 0.0  ;;  %v1183_v3 = vmax.f32 %v1119_v57, 0.0  ;;  %v1088_v4 = vadd.f32 %v1672_v42, %v1019_v58  ;;  %v1120_v5 = vadd.f32 %v1672_v42, %v1051_v59 }
 0x150   :  { %v1149_v6 = vmax.f32 %v1085_v62, 0.0  ;;  %v1181_v7 = vmax.f32 %v1117_v63, 0.0  ;;  %v1086_v8 = vadd.f32 %v1672_v42, %v1017_v0  ;;  %v1118_v9 = vadd.f32 %v1672_v42, %v1049_v1 }
 0x151   :  { %1215 = vst [vmem:[#allocation8 + $0x90] sm:$0xff] %v1151_v2  ;;  %1247 = vst [vmem:[#allocation8 + $0x190] sm:$0xff] %v1183_v3  ;;  %v1152_v10 = vmax.f32 %v1088_v4, 0.0  ;;  %v1184_v11 = vmax.f32 %v1120_v5, 0.0 }
 0x152   :  { %1213 = vst [vmem:[#allocation8 + $0x80] sm:$0xff] %v1149_v6  ;;  %1245 = vst [vmem:[#allocation8 + $0x180] sm:$0xff] %v1181_v7  ;;  %v1150_v12 = vmax.f32 %v1086_v8, 0.0  ;;  %v1182_v13 = vmax.f32 %v1118_v9, 0.0  ;;  %v1399_v14 = vpop.f32.mrb[20].mxu0  ;;  %v1431_v15 = vpop.f32.mrb[20].mxu1 }
 0x153   :  { %1216 = vst [vmem:[#allocation8 + $0x98] sm:$0xff] %v1152_v10  ;;  %1248 = vst [vmem:[#allocation8 + $0x198] sm:$0xff] %v1184_v11  ;;  %v1022_v16 = vmul.f32 %v1399_v14, %v1670_v40  ;;  %v1054_v17 = vmul.f32 %v1431_v15, %v1670_v40  ;;  %v489_v18 = vpop.f32.mrb[21].mxu0  ;;  %v617_v19 = vpop.f32.mrb[21].mxu1 }
 0x154   :  { %1214 = vst [vmem:[#allocation8 + $0x88] sm:$0xff] %v1150_v12  ;;  %1246 = vst [vmem:[#allocation8 + $0x188] sm:$0xff] %v1182_v13  ;;  %v1020_v20 = vmul.f32 %v1670_v40, %v489_v18  ;;  %v1052_v21 = vmul.f32 %v1670_v40, %v617_v19  ;;  %v1400_v22 = vpop.f32.mrb[22].mxu0  ;;  %v1432_v23 = vpop.f32.mrb[22].mxu1 }
 0x155   :  { %v1091_v24 = vadd.f32 %v1672_v42, %v1022_v16  ;;  %v1123_v25 = vadd.f32 %v1672_v42, %v1054_v17  ;;  %v1023_v26 = vmul.f32 %v1400_v22, %v1670_v40  ;;  %v1055_v27 = vmul.f32 %v1432_v23, %v1670_v40  ;;  %v492_v28 = vpop.f32.mrb[23].mxu0  ;;  %v620_v29 = vpop.f32.mrb[23].mxu1 }
 0x156   :  { %v1089_v30 = vadd.f32 %v1672_v42, %v1020_v20  ;;  %v1121_v31 = vadd.f32 %v1672_v42, %v1052_v21  ;;  %v1021_v32 = vmul.f32 %v1670_v40, %v492_v28  ;;  %v1053_v33 = vmul.f32 %v1670_v40, %v620_v29 }
 0x157   :  { %v1155_v34 = vmax.f32 %v1091_v24, 0.0  ;;  %v1187_v35 = vmax.f32 %v1123_v25, 0.0  ;;  %v1092_v36 = vadd.f32 %v1672_v42, %v1023_v26  ;;  %v1124_v37 = vadd.f32 %v1672_v42, %v1055_v27 }
 0x158   :  { %v1153_v38 = vmax.f32 %v1089_v30, 0.0  ;;  %v1185_v39 = vmax.f32 %v1121_v31, 0.0  ;;  %v1090_v41 = vadd.f32 %v1672_v42, %v1021_v32  ;;  %v1122_v43 = vadd.f32 %v1672_v42, %v1053_v33 }
 0x159   :  { %1219 = vst [vmem:[#allocation8 + $0xb0] sm:$0xff] %v1155_v34  ;;  %1251 = vst [vmem:[#allocation8 + $0x1b0] sm:$0xff] %v1187_v35  ;;  %v1156_v44 = vmax.f32 %v1092_v36, 0.0  ;;  %v1188_v45 = vmax.f32 %v1124_v37, 0.0 }
 0x15a   :  { %1217 = vst [vmem:[#allocation8 + $0xa0] sm:$0xff] %v1153_v38  ;;  %1249 = vst [vmem:[#allocation8 + $0x1a0] sm:$0xff] %v1185_v39  ;;  %v1154_v46 = vmax.f32 %v1090_v41, 0.0  ;;  %v1186_v47 = vmax.f32 %v1122_v43, 0.0  ;;  %v1403_v48 = vpop.f32.mrb[24].mxu0  ;;  %v1435_v49 = vpop.f32.mrb[24].mxu1 }
 0x15b   :  { %1220 = vst [vmem:[#allocation8 + $0xb8] sm:$0xff] %v1156_v44  ;;  %1252 = vst [vmem:[#allocation8 + $0x1b8] sm:$0xff] %v1188_v45  ;;  %v1026_v50 = vmul.f32 %v1403_v48, %v1670_v40  ;;  %v1058_v51 = vmul.f32 %v1435_v49, %v1670_v40  ;;  %v505_v52 = vpop.f32.mrb[25].mxu0  ;;  %v633_v53 = vpop.f32.mrb[25].mxu1 }
 0x15c   :  { %1218 = vst [vmem:[#allocation8 + $0xa8] sm:$0xff] %v1154_v46  ;;  %1250 = vst [vmem:[#allocation8 + $0x1a8] sm:$0xff] %v1186_v47  ;;  %v1024_v54 = vmul.f32 %v1670_v40, %v505_v52  ;;  %v1056_v55 = vmul.f32 %v1670_v40, %v633_v53  ;;  %v1404_v56 = vpop.f32.mrb[26].mxu0  ;;  %v1436_v57 = vpop.f32.mrb[26].mxu1 }
 0x15d   :  { %v1095_v58 = vadd.f32 %v1672_v42, %v1026_v50  ;;  %v1127_v59 = vadd.f32 %v1672_v42, %v1058_v51  ;;  %v1027_v60 = vmul.f32 %v1404_v56, %v1670_v40  ;;  %v1059_v61 = vmul.f32 %v1436_v57, %v1670_v40  ;;  %v508_v62 = vpop.f32.mrb[27].mxu0  ;;  %v636_v63 = vpop.f32.mrb[27].mxu1 }
 0x15e   :  { %v1093_v0 = vadd.f32 %v1672_v42, %v1024_v54  ;;  %v1125_v1 = vadd.f32 %v1672_v42, %v1056_v55  ;;  %v1025_v2 = vmul.f32 %v1670_v40, %v508_v62  ;;  %v1057_v3 = vmul.f32 %v1670_v40, %v636_v63 }
 0x15f   :  { %v1159_v4 = vmax.f32 %v1095_v58, 0.0  ;;  %v1191_v5 = vmax.f32 %v1127_v59, 0.0  ;;  %v1096_v6 = vadd.f32 %v1672_v42, %v1027_v60  ;;  %v1128_v7 = vadd.f32 %v1672_v42, %v1059_v61 }
 0x160   :  { %v1157_v8 = vmax.f32 %v1093_v0, 0.0  ;;  %v1189_v9 = vmax.f32 %v1125_v1, 0.0  ;;  %v1094_v10 = vadd.f32 %v1672_v42, %v1025_v2  ;;  %v1126_v11 = vadd.f32 %v1672_v42, %v1057_v3 }
 0x161   :  { %1223 = vst [vmem:[#allocation8 + $0xd0] sm:$0xff] %v1159_v4  ;;  %1255 = vst [vmem:[#allocation8 + $0x1d0] sm:$0xff] %v1191_v5  ;;  %v1160_v12 = vmax.f32 %v1096_v6, 0.0  ;;  %v1192_v13 = vmax.f32 %v1128_v7, 0.0 }
 0x162   :  { %1221 = vst [vmem:[#allocation8 + $0xc0] sm:$0xff] %v1157_v8  ;;  %1253 = vst [vmem:[#allocation8 + $0x1c0] sm:$0xff] %v1189_v9  ;;  %v1158_v14 = vmax.f32 %v1094_v10, 0.0  ;;  %v1190_v15 = vmax.f32 %v1126_v11, 0.0  ;;  %v1407_v16 = vpop.f32.mrb[28].mxu0  ;;  %v1439_v17 = vpop.f32.mrb[28].mxu1 }
 0x163   :  { %1224 = vst [vmem:[#allocation8 + $0xd8] sm:$0xff] %v1160_v12  ;;  %1256 = vst [vmem:[#allocation8 + $0x1d8] sm:$0xff] %v1192_v13  ;;  %v1030_v18 = vmul.f32 %v1407_v16, %v1670_v40  ;;  %v1062_v19 = vmul.f32 %v1439_v17, %v1670_v40  ;;  %v521_v20 = vpop.f32.mrb[29].mxu0  ;;  %v649_v21 = vpop.f32.mrb[29].mxu1 }
 0x164   :  { %1222 = vst [vmem:[#allocation8 + $0xc8] sm:$0xff] %v1158_v14  ;;  %1254 = vst [vmem:[#allocation8 + $0x1c8] sm:$0xff] %v1190_v15  ;;  %v1028_v22 = vmul.f32 %v1670_v40, %v521_v20  ;;  %v1060_v23 = vmul.f32 %v1670_v40, %v649_v21  ;;  %v1408_v24 = vpop.f32.mrb[30].mxu0  ;;  %v1440_v25 = vpop.f32.mrb[30].mxu1 }
 0x165   :  { %v1099_v26 = vadd.f32 %v1672_v42, %v1030_v18  ;;  %v1131_v27 = vadd.f32 %v1672_v42, %v1062_v19  ;;  %v1031_v28 = vmul.f32 %v1408_v24, %v1670_v40  ;;  %v1063_v29 = vmul.f32 %v1440_v25, %v1670_v40  ;;  %v524_v30 = vpop.f32.mrb[31].mxu0  ;;  %v652_v31 = vpop.f32.mrb[31].mxu1 }
 0x166   :  { %v1097_v32 = vadd.f32 %v1672_v42, %v1028_v22  ;;  %v1129_v33 = vadd.f32 %v1672_v42, %v1060_v23  ;;  %v1029_v34 = vmul.f32 %v1670_v40, %v524_v30  ;;  %v1061_v35 = vmul.f32 %v1670_v40, %v652_v31 }
 0x167   :  { %v1163_v36 = vmax.f32 %v1099_v26, 0.0  ;;  %v1195_v37 = vmax.f32 %v1131_v27, 0.0  ;;  %v1100_v38 = vadd.f32 %v1672_v42, %v1031_v28  ;;  %v1132_v39 = vadd.f32 %v1672_v42, %v1063_v29 }
 0x168   :  { %v1161_v41 = vmax.f32 %v1097_v32, 0.0  ;;  %v1193_v43 = vmax.f32 %v1129_v33, 0.0  ;;  %v1098_v44 = vadd.f32 %v1672_v42, %v1029_v34  ;;  %v1130_v45 = vadd.f32 %v1672_v42, %v1061_v35 }
 0x169   :  { %1227 = vst [vmem:[#allocation8 + $0xf0] sm:$0xff] %v1163_v36  ;;  %1259 = vst [vmem:[#allocation8 + $0x1f0] sm:$0xff] %v1195_v37  ;;  %v1164_v46 = vmax.f32 %v1100_v38, 0.0  ;;  %v1196_v47 = vmax.f32 %v1132_v39, 0.0 }
 0x16a   :  { %1225 = vst [vmem:[#allocation8 + $0xe0] sm:$0xff] %v1161_v41  ;;  %1257 = vst [vmem:[#allocation8 + $0x1e0] sm:$0xff] %v1193_v43  ;;  %v1162_v40 = vmax.f32 %v1098_v44, 0.0  ;;  %v1194_v48 = vmax.f32 %v1130_v45, 0.0 }
 0x16b   :  { %1228 = vst [vmem:[#allocation8 + $0xf8] sm:$0xff] %v1164_v46  ;;  %1260 = vst [vmem:[#allocation8 + $0x1f8] sm:$0xff] %v1196_v47 }
 0x16c   :  { %1226 = vst [vmem:[#allocation8 + $0xe8] sm:$0xff] %v1162_v40  ;;  %1258 = vst [vmem:[#allocation8 + $0x1e8] sm:$0xff] %v1194_v48 }
 0x16d   :  { %1582 = shalt.err (!%p1579_p0)
}
 0x16e   :  { %s1583_s25 = scalar_lea.hbm %s1817_s3, 8192 }
 0x16f   :  { %p1584_p1 = scmp.ne.s32.totalorder %s1817_s3, %s1583_s25  ;;  %p1587_p2 = scmp.lt.u32.totalorder %s1583_s25, %s1817_s3 }
 0x171   :  { %p1589_p3 = pnand %p1587_p2, %p1584_p1 }
 0x173   :  { %1592 = shalt.err (!%p1589_p3)
}
 0x174   :  { %s1605_s30 = smov 128   ;;  %s1606_s4 = smov 8  }
 0x175   :  { %1272 = dma.vmem_to_hbm [thread:$0]  %s1267_s21, 8192, %s1817_s3, [#allocation4], %s1605_s30, %s1605_s30, %s1606_s4  }
 0x176   :  { %1597 = dma.done.wait [#allocation4], 8192  }
 0x177   :  { %1598 = vsyncadd [#allocation4], 4294959104 }
 0x178   :  { %1276 = vsyncpa [#allocation3], 1 }
 0x179   :  { %1277 = vsyncpa [#allocation6], 1 }
 0x17a   :  { %1278 = vsyncpa [#allocation4], 1 }

</bundles_post_ra>
